<compile_context>
chip_gen: v5e
topology: v5e:2x2
jax: 0.10.0
libtpu: 0.0.40
codegen_flags: <defaults>
</compile_context>

<pallas_src>
import functools

import jax
import jax.numpy as jnp
from jax.experimental import pallas as pl
from jax.experimental.pallas import tpu as pltpu


def _round_up(x, m):
    return ((x + m - 1) // m) * m


def _time_embedding_kernel(t_ref, packA_ref, packB_ref, out_ref, *, hp):
    # t: (TB, 1) f32 timesteps.
    t = t_ref[...]

    # Unpack the fused parameter buffers (static, sublane-aligned slices).
    w2 = packA_ref[:hp, :]                      # (Hp, Hp)
    vecsA = packA_ref[hp:hp + 8, :]             # rows: 0=w1, 1=b1, 2=b2
    w1 = vecsA[0:1, :]                          # (1, Hp)
    b1 = vecsA[1:2, :]                          # (1, Hp)
    b2 = vecsA[2:3, :]                          # (1, Hp)
    w3 = packB_ref[:hp, :]                      # (Hp, Dp)
    b3 = packB_ref[hp:hp + 8, :][0:1, :]        # (1, Dp)

    # Layer 1 on the VPU: (B,1) x (1,H) contraction is just a broadcast FMA.
    h1 = jnp.maximum(t * w1 + b1, 0.0)          # (TB, Hp)

    # Layers 2 and 3 on the MXU with f32 accumulation.
    h2 = jnp.maximum(
        jnp.dot(h1, w2, preferred_element_type=jnp.float32) + b2, 0.0)
    out = jnp.dot(h2, w3, preferred_element_type=jnp.float32) + b3

    out_ref[...] = out.astype(out_ref.dtype)    # lane-dense (TB, Dp) store


def time_embedding(time, params, *, block_b=256):
    """time: (B,) any numeric dtype. params: dict of (w1,b1,w2,b2,w3,b3).

    Weights are stored (in_features, out_features) -- transpose of PyTorch's
    nn.Linear weight -- so the kernel computes y = x @ W + b directly.
    """
    w1, b1, w2, b2, w3, b3 = (params[k] for k in ("w1", "b1", "w2", "b2", "w3", "b3"))
    H = w2.shape[0]
    D = w3.shape[1]
    Hp = _round_up(H, 128)                      # lane-dense hidden width
    Dp = _round_up(D, 128)                      # lane-dense output width

    B = time.shape[0]
    TB = min(_round_up(max(B, 1), 8), block_b)  # B tile, multiple of 8
    Bp = _round_up(B, TB)

    # (B,) -> (Bp, 1) f32; zero rows beyond B are sliced away below.
    t2d = time.reshape(-1, 1).astype(jnp.float32)
    t2d = jnp.pad(t2d, ((0, Bp - B), (0, 0)))

    # Pack all layer-1/2 parameters into one lane-width-Hp buffer.
    # Zero padding keeps the computation exact after slicing out [:D].
    packA = jnp.zeros((Hp + 8, Hp), jnp.float32)
    packA = packA.at[:H, :H].set(w2.astype(jnp.float32))
    packA = packA.at[Hp, :H].set(w1.reshape(-1).astype(jnp.float32))
    packA = packA.at[Hp + 1, :H].set(b1.reshape(-1).astype(jnp.float32))
    packA = packA.at[Hp + 2, :H].set(b2.reshape(-1).astype(jnp.float32))

    # Pack layer-3 parameters into one lane-width-Dp buffer.
    packB = jnp.zeros((Hp + 8, Dp), jnp.float32)
    packB = packB.at[:H, :D].set(w3.astype(jnp.float32))
    packB = packB.at[Hp, :D].set(b3.reshape(-1).astype(jnp.float32))

    grid = (Bp // TB,)
    out_padded = pl.pallas_call(
        functools.partial(_time_embedding_kernel, hp=Hp),
        out_shape=jax.ShapeDtypeStruct((Bp, Dp), jnp.float32),
        grid_spec=pltpu.PrefetchScalarGridSpec(
            num_scalar_prefetch=0,
            grid=grid,
            in_specs=[
                pl.BlockSpec((TB, 1), lambda i: (i, 0)),          # t tiles over B
                pl.BlockSpec((Hp + 8, Hp), lambda i: (0, 0)),     # resident weights
                pl.BlockSpec((Hp + 8, Dp), lambda i: (0, 0)),     # resident weights
            ],
            out_specs=pl.BlockSpec((TB, Dp), lambda i: (i, 0)),   # lane-dense output
        ),
        compiler_params=pltpu.CompilerParams(
            dimension_semantics=("parallel",),
        ),
    )(t2d, packA, packB)

    # Slice the real batch/dim back out (padding was all-zero, so exact).
    return out_padded[:B, :D]


def init_params(key, dim, hidden_dim):
    """Deterministic synthetic init (shapes match the nn.Linear layers)."""
    k1, k2, k3, k4, k5, k6 = jax.random.split(key, 6)
    # stored as (in, out); PyTorch stores (out, in)
    w1 = jax.random.normal(k1, (1, hidden_dim), jnp.float32) * 0.5
    b1 = jax.random.normal(k2, (1, hidden_dim), jnp.float32) * 0.1
    w2 = jax.random.normal(k3, (hidden_dim, hidden_dim), jnp.float32) * (1.0 / hidden_dim ** 0.5)
    b2 = jax.random.normal(k4, (1, hidden_dim), jnp.float32) * 0.1
    w3 = jax.random.normal(k5, (hidden_dim, dim), jnp.float32) * (1.0 / hidden_dim ** 0.5)
    b3 = jax.random.normal(k6, (1, dim), jnp.float32) * 0.1
    return {"w1": w1, "b1": b1, "w2": w2, "b2": b2, "w3": w3, "b3": b3}


def time_embedding_ref(time, p):
    t = time.reshape(-1, 1).astype(jnp.float32)
    h1 = jnp.maximum(t @ p["w1"] + p["b1"], 0.0)
    h2 = jnp.maximum(h1 @ p["w2"] + p["b2"], 0.0)
    return h2 @ p["w3"] + p["b3"]


if __name__ == "__main__":
    key = jax.random.PRNGKey(0)
    kp, kt = jax.random.split(key)

    B, DIM, HIDDEN = 8, 16, 32          # small shapes consistent with the module
    params = init_params(kp, DIM, HIDDEN)
    # timesteps, e.g. diffusion steps in [0, 1000)
    time = jax.random.uniform(kt, (B,), jnp.float32, 0.0, 1000.0)

    out = time_embedding(time, params)
    out = jax.block_until_ready(out)

    ref = time_embedding_ref(time, params)
    assert out.shape == (B, DIM)
    assert jnp.allclose(out, ref, atol=1e-4, rtol=1e-4)

    print("KERNEL_OK")
</pallas_src>

<mosaic_0001>
module attributes {stable_mosaic.version = 11 : i64} {
  func.func @_time_embedding_kernel(%arg0: i32, %arg1: memref<8x1xf32, #tpu.memory_space<vmem>>, %arg2: memref<136x128xf32, #tpu.memory_space<vmem>>, %arg3: memref<136x128xf32, #tpu.memory_space<vmem>>, %arg4: memref<8x128xf32, #tpu.memory_space<vmem>>) attributes {dimension_semantics = [#tpu.dimension_semantics<parallel>], iteration_bounds = array<i64: 1>, scalar_prefetch = 0 : i64, scratch_operands = 0 : i64, tpu.core_type = #tpu.core_type<tc>, window_params = [{transform_indices = @transform_0, window_bounds = array<i64: 8, 1>}, {pipeline_mode = #tpu.pipeline_mode<synchronous>, transform_indices = @transform_1, window_bounds = array<i64: 136, 128>}, {pipeline_mode = #tpu.pipeline_mode<synchronous>, transform_indices = @transform_2, window_bounds = array<i64: 136, 128>}, {transform_indices = @transform_3, window_bounds = array<i64: 8, 128>}]} {
    %c0 = arith.constant 0 : index
    %c0_0 = arith.constant 0 : index
    %0 = vector.load %arg1[%c0, %c0_0] : memref<8x1xf32, #tpu.memory_space<vmem>>, vector<8x1xf32>
    %c0_1 = arith.constant 0 : index
    %c0_2 = arith.constant 0 : index
    %1 = vector.load %arg2[%c0_1, %c0_2] : memref<136x128xf32, #tpu.memory_space<vmem>>, vector<128x128xf32>
    %c128 = arith.constant 128 : index
    %c0_3 = arith.constant 0 : index
    %2 = vector.load %arg2[%c128, %c0_3] : memref<136x128xf32, #tpu.memory_space<vmem>>, vector<8x128xf32>
    %3 = vector.extract_strided_slice %2 {offsets = [0, 0], sizes = [1, 128], strides = [1, 1]} : vector<8x128xf32> to vector<1x128xf32>
    %4 = vector.extract_strided_slice %2 {offsets = [1, 0], sizes = [1, 128], strides = [1, 1]} : vector<8x128xf32> to vector<1x128xf32>
    %5 = vector.extract_strided_slice %2 {offsets = [2, 0], sizes = [1, 128], strides = [1, 1]} : vector<8x128xf32> to vector<1x128xf32>
    %c0_4 = arith.constant 0 : index
    %c0_5 = arith.constant 0 : index
    %6 = vector.load %arg3[%c0_4, %c0_5] : memref<136x128xf32, #tpu.memory_space<vmem>>, vector<128x128xf32>
    %c128_6 = arith.constant 128 : index
    %c0_7 = arith.constant 0 : index
    %7 = vector.load %arg3[%c128_6, %c0_7] : memref<136x128xf32, #tpu.memory_space<vmem>>, vector<8x128xf32>
    %8 = vector.extract_strided_slice %7 {offsets = [0, 0], sizes = [1, 128], strides = [1, 1]} : vector<8x128xf32> to vector<1x128xf32>
    %9 = vector.broadcast %0 : vector<8x1xf32> to vector<8x128xf32>
    %10 = vector.broadcast %3 : vector<1x128xf32> to vector<8x128xf32>
    %11 = arith.mulf %9, %10 : vector<8x128xf32>
    %12 = vector.broadcast %4 : vector<1x128xf32> to vector<8x128xf32>
    %13 = arith.addf %11, %12 : vector<8x128xf32>
    %cst = arith.constant 0.000000e+00 : f32
    %14 = vector.broadcast %cst : f32 to vector<8x128xf32>
    %15 = arith.maximumf %13, %14 : vector<8x128xf32>
    %cst_8 = arith.constant dense<0.000000e+00> : vector<8x128xf32>
    %16 = tpu.matmul %15, %1, %cst_8 {dimension_numbers = #tpu.dot_dimension_numbers<[1], [0], [0], [1], [0, 0, 1, 1], [], []>} : vector<8x128xf32>, vector<128x128xf32>, vector<8x128xf32> -> vector<8x128xf32>
    %17 = vector.broadcast %5 : vector<1x128xf32> to vector<8x128xf32>
    %18 = arith.addf %16, %17 : vector<8x128xf32>
    %cst_9 = arith.constant 0.000000e+00 : f32
    %19 = vector.broadcast %cst_9 : f32 to vector<8x128xf32>
    %20 = arith.maximumf %18, %19 : vector<8x128xf32>
    %cst_10 = arith.constant dense<0.000000e+00> : vector<8x128xf32>
    %21 = tpu.matmul %20, %6, %cst_10 {dimension_numbers = #tpu.dot_dimension_numbers<[1], [0], [0], [1], [0, 0, 1, 1], [], []>} : vector<8x128xf32>, vector<128x128xf32>, vector<8x128xf32> -> vector<8x128xf32>
    %22 = vector.broadcast %8 : vector<1x128xf32> to vector<8x128xf32>
    %23 = arith.addf %21, %22 : vector<8x128xf32>
    %c0_11 = arith.constant 0 : index
    %c0_12 = arith.constant 0 : index
    %24 = vector.load %arg4[%c0_11, %c0_12] : memref<8x128xf32, #tpu.memory_space<vmem>>, vector<8x128xf32>
    tpu.vector_store %arg4[%c0_11, %c0_12], %23 {strides = array<i32>} : memref<8x128xf32, #tpu.memory_space<vmem>>, vector<8x128xf32>,
    return
  }
  func.func @transform_0(%arg0: i32) -> (i32, i32) {
    %c0_i32 = arith.constant 0 : i32
    %c0_i32_0 = arith.constant 0 : i32
    return %arg0, %c0_i32 : i32, i32
  }
  func.func @transform_1(%arg0: i32) -> (i32, i32) {
    %c0_i32 = arith.constant 0 : i32
    %c0_i32_0 = arith.constant 0 : i32
    %c0_i32_1 = arith.constant 0 : i32
    return %c0_i32, %c0_i32_0 : i32, i32
  }
  func.func @transform_2(%arg0: i32) -> (i32, i32) {
    %c0_i32 = arith.constant 0 : i32
    %c0_i32_0 = arith.constant 0 : i32
    %c0_i32_1 = arith.constant 0 : i32
    return %c0_i32, %c0_i32_0 : i32, i32
  }
  func.func @transform_3(%arg0: i32) -> (i32, i32) {
    %c0_i32 = arith.constant 0 : i32
    %c0_i32_0 = arith.constant 0 : i32
    return %arg0, %c0_i32 : i32, i32
  }
}

</mosaic_0001>

<bundles_post_ra>
// kernel: tpu_custom_call.1
= control target key start
LH: loop header
LB: loop body
LE: loop exit
PB: predicated region body
PF: predicated region fallthrough
CT: control target
= control target key end

     0   :  { %8 = vsyncpa [#allocation3], 0  ;;  %s277_s0 = inlined_call_operand.vmem [shape: f32[8,1], index: 0, kind: input, shape index: {}]   ;;  %s278_s1 = inlined_call_operand.hbm [shape: f32[136,128], index: 1, kind: input, shape index: {}]   ;;  %s279_s2 = inlined_call_operand.hbm [shape: f32[136,128], index: 2, kind: input, shape index: {}]   ;;  %s280_s3 = inlined_call_operand.hbm [shape: f32[8,128], index: 3, kind: output, shape index: {}]  }
   0x1   :  { %9 = vsyncpa [#allocation6], 0 }
   0x2   :  { %10 = vsyncpa [#allocation4], 0  ;;  %s17_s14 = sshll.u32 %s278_s1, 4  ;;  %s239_s15 = smov [#allocation2]   ;;  %s18_s14 = int_to_ptr.hbm [resolvable:$true] %s17_s14 }
   0x3   :  { %s19_s16 = sshll.u32 %s239_s15, 4  ;;  %s30_s19 = sshll.u32 %s279_s2, 4  ;;  %s20_s16 = int_to_ptr.vmem [resolvable:$true] %s19_s16  ;;  %s31_s19 = int_to_ptr.hbm [resolvable:$true] %s30_s19 }
   0x4   :  { %s240_s20 = smov 128   ;;  %s241_s21 = smov 8  }
   0x5   :  { %25 = dma.hbm_to_vmem [thread:$0]  %s18_s14, 2176, %s20_s16, [#allocation3], %s240_s20, %s240_s20, %s241_s21  }
   0x6   :  { %s242_s22 = smov [#allocation5]  }
   0x7   :  { %s32_s23 = sshll.u32 %s242_s22, 4  ;;  %s33_s23 = int_to_ptr.vmem [resolvable:$true] %s32_s23 }
   0x8   :  { %38 = dma.hbm_to_vmem [thread:$0]  %s31_s19, 2176, %s33_s23, [#allocation6], %s240_s20, %s240_s20, %s241_s21  }
   0x9   :  { %233 = dma.done.wait [#allocation3], 2176  }
   0xa   :  { %234 = vsyncadd [#allocation3], 4294965120 }
   0xb   :  { %235 = dma.done.wait [#allocation6], 2176  }
   0xc   :  { %236 = vsyncadd [#allocation6], 4294965120  ;;  %v243_v0 = vmov 0   ;;  %v47_v1 = vld [vmem:[%s277_s0] sm:$0xff]  ;;  %v63_v2 = vld [vmem:[#allocation2 + $0x78] sm:$0xff]  ;;  %s244_s0 = smov [#allocation7]  }
   0xd   :  { %160 = vset.pattern.permute.xlu0 %v243_v0  ;;  %v62_v3 = vld [vmem:[#allocation2 + $0x70] sm:$0xff]  ;;  %93 = vmatpush.msra.mxu0 %v63_v2  ;;  %v61_v4 = vld [vmem:[#allocation2 + $0x68] sm:$0xff]  ;;  %v60_v5 = vld [vmem:[#allocation2 + $0x60] sm:$0xff]  ;;  %s141_s2 = sshll.u32 %s244_s0, 4  ;;  %s143_s27 = sshll.u32 %s280_s3, 4  ;;  %s142_s2 = int_to_ptr.vmem [resolvable:$true] %s141_s2  ;;  %s144_s27 = int_to_ptr.hbm [resolvable:$true] %s143_s27 }
   0xe   :  { %84 = vperm.xlu0 %160, %v47_v1   ;;  %v59_v6 = vld [vmem:[#allocation2 + $0x58] sm:$0xff]  ;;  %v58_v7 = vld [vmem:[#allocation2 + $0x50] sm:$0xff]  ;;  %v57_v8 = vld [vmem:[#allocation2 + $0x48] sm:$0xff] }
   0xf   :  { %94 = vmatpush.msra.mxu0 %v62_v3  ;;  %v56_v9 = vld [vmem:[#allocation2 + $0x40] sm:$0xff]  ;;  %v55_v10 = vld [vmem:[#allocation2 + $0x38] sm:$0xff]  ;;  %v54_v11 = vld [vmem:[#allocation2 + $0x30] sm:$0xff] }
  0x10   :  { %v53_v12 = vld [vmem:[#allocation2 + $0x28] sm:$0xff]  ;;  %v52_v13 = vld [vmem:[#allocation2 + $0x20] sm:$0xff]  ;;  %v51_v14 = vld [vmem:[#allocation2 + $0x18] sm:$0xff] }
  0x11   :  { %95 = vmatpush.msra.mxu0 %v61_v4  ;;  %v50_v15 = vld [vmem:[#allocation2 + $0x10] sm:$0xff]  ;;  %v49_v16 = vld [vmem:[#allocation2 + $0x8] sm:$0xff]  ;;  %v48_v17 = vld [vmem:[#allocation2] sm:$0xff] }
  0x12   :  { %v80_v18 = vld [vmem:[#allocation5 + $0x78] sm:$0xff]  ;;  %v79_v19 = vld [vmem:[#allocation5 + $0x70] sm:$0xff]  ;;  %v78_v20 = vld [vmem:[#allocation5 + $0x68] sm:$0xff] }
  0x13   :  { %96 = vmatpush.msra.mxu0 %v60_v5  ;;  %115 = vmatpush.msra.mxu1 %v80_v18  ;;  %v77_v21 = vld [vmem:[#allocation5 + $0x60] sm:$0xff]  ;;  %v76_v22 = vld [vmem:[#allocation5 + $0x58] sm:$0xff]  ;;  %v75_v23 = vld [vmem:[#allocation5 + $0x50] sm:$0xff] }
  0x14   :  { %v74_v24 = vld [vmem:[#allocation5 + $0x48] sm:$0xff]  ;;  %v73_v25 = vld [vmem:[#allocation5 + $0x40] sm:$0xff]  ;;  %v72_v26 = vld [vmem:[#allocation5 + $0x38] sm:$0xff] }
  0x15   :  { %97 = vmatpush.msra.mxu0 %v59_v6  ;;  %116 = vmatpush.msra.mxu1 %v79_v19  ;;  %v71_v27 = vld [vmem:[#allocation5 + $0x30] sm:$0xff]  ;;  %v70_v28 = vld [vmem:[#allocation5 + $0x28] sm:$0xff]  ;;  %v64_v29 = vld [vmem:[#allocation2 + $0x80] sm:$0xff] }
  0x16   :  { %v69_v30 = vld [vmem:[#allocation5 + $0x20] sm:$0xff]  ;;  %v87_v31 = vperm.slane %v64_v29, 0  ;;  %v68_v32 = vld [vmem:[#allocation5 + $0x18] sm:$0xff]  ;;  %v89_v33 = vperm.slane %v64_v29, 1  ;;  %v67_v38 = vld [vmem:[#allocation5 + $0x10] sm:$0xff]  ;;  %v92_v41 = vperm.slane %v64_v29, 2 }
  0x17   :  { %98 = vmatpush.msra.mxu0 %v58_v7  ;;  %117 = vmatpush.msra.mxu1 %v78_v20  ;;  %v66_v39 = vld [vmem:[#allocation5 + $0x8] sm:$0xff]  ;;  %v65_v40 = vld [vmem:[#allocation5] sm:$0xff] }
  0x18   :  { %v81_v45 = vld [vmem:[#allocation5 + $0x80] sm:$0xff] }
  0x19   :  { %99 = vmatpush.msra.mxu0 %v57_v8  ;;  %118 = vmatpush.msra.mxu1 %v77_v21  ;;  %v114_v46 = vperm.slane %v81_v45, 0 }
  0x1b   :  { %100 = vmatpush.msra.mxu0 %v56_v9  ;;  %119 = vmatpush.msra.mxu1 %v76_v22 }
  0x1d   :  { %101 = vmatpush.msra.mxu0 %v55_v10  ;;  %120 = vmatpush.msra.mxu1 %v75_v23 }
  0x1f   :  { %102 = vmatpush.msra.mxu0 %v54_v11  ;;  %121 = vmatpush.msra.mxu1 %v74_v24 }
  0x21   :  { %103 = vmatpush.msra.mxu0 %v53_v12  ;;  %122 = vmatpush.msra.mxu1 %v73_v25 }
  0x23   :  { %104 = vmatpush.msra.mxu0 %v52_v13  ;;  %123 = vmatpush.msra.mxu1 %v72_v26 }
  0x25   :  { %105 = vmatpush.msra.mxu0 %v51_v14  ;;  %124 = vmatpush.msra.mxu1 %v71_v27 }
  0x27   :  { %106 = vmatpush.msra.mxu0 %v50_v15  ;;  %125 = vmatpush.msra.mxu1 %v70_v28 }
  0x29   :  { %107 = vmatpush.msra.mxu0 %v49_v16  ;;  %126 = vmatpush.msra.mxu1 %v69_v30 }
  0x2b   :  { %108 = vmatpush.msra.mxu0 %v48_v17  ;;  %127 = vmatpush.msra.mxu1 %v68_v32 }
  0x2d   :  { %128 = vmatpush.msra.mxu1 %v67_v38 }
  0x2f   :  { %129 = vmatpush.msra.mxu1 %v66_v39 }
  0x31   :  { %130 = vmatpush.msra.mxu1 %v65_v40 }
  0x80   :  { %v85_v34 = vpop.permute.xlu0 %84 }
  0x81   :  { %v88_v35 = vmul.f32 %v87_v31, %v85_v34 }
  0x83   :  { %v90_v36 = vadd.f32 %v89_v33, %v88_v35 }
  0x85   :  { %v91_v37 = vmax.f32 %v90_v36, 0.0 }
  0x87   :  { %109 = vmatmul.f32.vlgmr.msra.gmra.mxu0 %v91_v37 }
 0x104   :  { %v110_v42 = vpop.f32.mrf.mxu0 }
 0x105   :  { %v111_v43 = vadd.f32 %v110_v42, %v92_v41 }
 0x107   :  { %v113_v44 = vmax.f32 %v111_v43, 0.0 }
 0x109   :  { %131 = vmatmul.f32.vlgmr.msra.gmra.mxu1 %v113_v44 }
 0x186   :  { %v132_v47 = vpop.f32.mrf.mxu1 }
 0x187   :  { %v133_v48 = vadd.f32 %v132_v47, %v114_v46 }
 0x189   :  { %135 = vst [vmem:[#allocation7] sm:$0xff] %v133_v48 }
 0x18a   :  { %146 = dma.vmem_to_hbm [thread:$0]  %s142_s2, 128, %s144_s27, [#allocation4]  }
 0x18b   :  { %237 = dma.done.wait [#allocation4], 128  }
 0x18c   :  { %238 = vsyncadd [#allocation4], 4294967168 }
 0x18d   :  { %151 = vsyncpa [#allocation3], 1 }
 0x18e   :  { %152 = vsyncpa [#allocation6], 1 }
 0x18f   :  { %153 = vsyncpa [#allocation4], 1 }

</bundles_post_ra>
